<compile_context>
chip_gen: v6e
topology: v6e:2x2x1
jax: 0.10.0
libtpu: 0.0.40
codegen_flags: <defaults>
</compile_context>

<pallas_src>
import functools

import jax
import jax.numpy as jnp
from jax.experimental import pallas as pl
from jax.experimental.pallas import tpu as pltpu

HID1_SIZE = 64


def _mlp_softmax_kernel(x_ref, w1_ref, b1_ref, w2_ref, b2_ref, out_ref):
    # fc1 + tanh  (MXU matmul with f32 accumulation; tanh on the EUP)
    x = x_ref[...]
    h = jnp.tanh(
        jnp.dot(x, w1_ref[...], preferred_element_type=jnp.float32) + b1_ref[...]
    )
    # fc2
    logits = (
        jnp.dot(h, w2_ref[...], preferred_element_type=jnp.float32) + b2_ref[...]
    )
    # numerically-stable softmax along the last axis (exact normalization so
    # rows sum to 1 to f32 precision)
    m = jnp.max(logits, axis=-1, keepdims=True)
    e = jnp.exp(logits - m)
    denom = jnp.sum(e, axis=-1, keepdims=True)
    out_ref[...] = (e / denom).astype(out_ref.dtype)


@functools.partial(jax.jit, static_argnames=("tile_b",))
def model_forward(x, w1, b1, w2, b2, *, tile_b=2048):
    """x: (B, obs_dim) f32. Returns (B, act_dim) softmax probabilities."""
    batch, obs_dim = x.shape
    act_dim = w2.shape[1]

    # Batch tile: either the full (small) batch, or a multiple of 8 sublanes.
    if batch <= tile_b:
        tile_b = batch
    else:
        tile_b = max(8, (tile_b // 8) * 8)
    grid = (pl.cdiv(batch, tile_b),)

    # Advisory cost hint for XLA's scheduler when embedded in a larger graph.
    flops = 2 * batch * (obs_dim * HID1_SIZE + HID1_SIZE * act_dim)
    transcendentals = batch * (HID1_SIZE + act_dim)
    bytes_accessed = 4 * (
        x.size + w1.size + b1.size + w2.size + b2.size + batch * act_dim
    )

    return pl.pallas_call(
        _mlp_softmax_kernel,
        out_shape=jax.ShapeDtypeStruct((batch, act_dim), jnp.float32),
        grid=grid,
        in_specs=[
            # streamed per batch tile
            pl.BlockSpec((tile_b, obs_dim), lambda i: (i, 0)),
            # weights / biases: constant index_map -> resident across the grid
            pl.BlockSpec((obs_dim, HID1_SIZE), lambda i: (0, 0)),
            pl.BlockSpec((1, HID1_SIZE), lambda i: (0, 0)),
            pl.BlockSpec((HID1_SIZE, act_dim), lambda i: (0, 0)),
            pl.BlockSpec((1, act_dim), lambda i: (0, 0)),
        ],
        out_specs=pl.BlockSpec((tile_b, act_dim), lambda i: (i, 0)),
        compiler_params=pltpu.CompilerParams(
            dimension_semantics=("parallel",),  # megacore sharding on v7x
        ),
        cost_estimate=pl.CostEstimate(
            flops=flops,
            transcendentals=transcendentals,
            bytes_accessed=bytes_accessed,
        ),
    )(x, w1, b1, w2, b2)


def init_params(key, obs_dim, act_dim):
    """Deterministic synthetic initialization (PyTorch-Linear-like uniform)."""
    k1, k2, k3, k4 = jax.random.split(key, 4)
    bound1 = 1.0 / jnp.sqrt(obs_dim)
    bound2 = 1.0 / jnp.sqrt(HID1_SIZE)
    w1 = jax.random.uniform(k1, (obs_dim, HID1_SIZE), jnp.float32, -bound1, bound1)
    b1 = jax.random.uniform(k2, (1, HID1_SIZE), jnp.float32, -bound1, bound1)
    w2 = jax.random.uniform(k3, (HID1_SIZE, act_dim), jnp.float32, -bound2, bound2)
    b2 = jax.random.uniform(k4, (1, act_dim), jnp.float32, -bound2, bound2)
    return w1, b1, w2, b2


def _reference(x, w1, b1, w2, b2):
    h = jnp.tanh(x @ w1 + b1)
    return jax.nn.softmax(h @ w2 + b2, axis=-1)


if __name__ == "__main__":
    key = jax.random.PRNGKey(0)
    k_x, k_x2, k_p = jax.random.split(key, 3)

    obs_dim, act_dim = 16, 4
    w1, b1, w2, b2 = init_params(k_p, obs_dim, act_dim)

    # Case 1: small batch, single grid step (full block).
    batch = 8
    x = jax.random.normal(k_x, (batch, obs_dim), jnp.float32)
    prob = jax.block_until_ready(model_forward(x, w1, b1, w2, b2))
    assert prob.shape == (batch, act_dim)
    ref = _reference(x, w1, b1, w2, b2)
    assert jnp.allclose(prob, ref, rtol=2e-3, atol=2e-3)
    assert jnp.allclose(jnp.sum(prob, axis=-1), jnp.ones((batch,)), atol=2e-3)

    # Case 2: larger batch with a small tile to exercise the pipelined grid.
    batch2 = 64
    x2 = jax.random.normal(k_x2, (batch2, obs_dim), jnp.float32)
    prob2 = jax.block_until_ready(model_forward(x2, w1, b1, w2, b2, tile_b=16))
    assert prob2.shape == (batch2, act_dim)
    ref2 = _reference(x2, w1, b1, w2, b2)
    assert jnp.allclose(prob2, ref2, rtol=2e-3, atol=2e-3)
    assert jnp.allclose(jnp.sum(prob2, axis=-1), jnp.ones((batch2,)), atol=2e-3)

    print("KERNEL_OK")
</pallas_src>

<mosaic_0001>
module attributes {stable_mosaic.version = 11 : i64} {
  func.func @_mlp_softmax_kernel(%arg0: i32, %arg1: memref<8x16xf32, #tpu.memory_space<vmem>>, %arg2: memref<16x64xf32, #tpu.memory_space<vmem>>, %arg3: memref<1x64xf32, #tpu.memory_space<vmem>>, %arg4: memref<64x4xf32, #tpu.memory_space<vmem>>, %arg5: memref<1x4xf32, #tpu.memory_space<vmem>>, %arg6: memref<8x4xf32, #tpu.memory_space<vmem>>) attributes {dimension_semantics = [#tpu.dimension_semantics<parallel>], iteration_bounds = array<i64: 1>, scalar_prefetch = 0 : i64, scratch_operands = 0 : i64, tpu.core_type = #tpu.core_type<tc>, window_params = [{transform_indices = @transform_0, window_bounds = array<i64: 8, 16>}, {pipeline_mode = #tpu.pipeline_mode<synchronous>, transform_indices = @transform_1, window_bounds = array<i64: 16, 64>}, {pipeline_mode = #tpu.pipeline_mode<synchronous>, transform_indices = @transform_2, window_bounds = array<i64: 1, 64>}, {pipeline_mode = #tpu.pipeline_mode<synchronous>, transform_indices = @transform_3, window_bounds = array<i64: 64, 4>}, {pipeline_mode = #tpu.pipeline_mode<synchronous>, transform_indices = @transform_4, window_bounds = array<i64: 1, 4>}, {transform_indices = @transform_5, window_bounds = array<i64: 8, 4>}]} {
    %c0 = arith.constant 0 : index
    %c0_0 = arith.constant 0 : index
    %0 = vector.load %arg1[%c0, %c0_0] : memref<8x16xf32, #tpu.memory_space<vmem>>, vector<8x16xf32>
    %c0_1 = arith.constant 0 : index
    %c0_2 = arith.constant 0 : index
    %1 = vector.load %arg2[%c0_1, %c0_2] : memref<16x64xf32, #tpu.memory_space<vmem>>, vector<16x64xf32>
    %cst = arith.constant dense<0.000000e+00> : vector<8x64xf32>
    %2 = tpu.matmul %0, %1, %cst {dimension_numbers = #tpu.dot_dimension_numbers<[1], [0], [0], [1], [0, 0, 1, 1], [], []>} : vector<8x16xf32>, vector<16x64xf32>, vector<8x64xf32> -> vector<8x64xf32>
    %c0_3 = arith.constant 0 : index
    %c0_4 = arith.constant 0 : index
    %3 = vector.load %arg3[%c0_3, %c0_4] : memref<1x64xf32, #tpu.memory_space<vmem>>, vector<1x64xf32>
    %4 = vector.broadcast %3 : vector<1x64xf32> to vector<8x64xf32>
    %5 = arith.addf %2, %4 : vector<8x64xf32>
    %6 = math.tanh %5 : vector<8x64xf32>
    %c0_5 = arith.constant 0 : index
    %c0_6 = arith.constant 0 : index
    %7 = vector.load %arg4[%c0_5, %c0_6] : memref<64x4xf32, #tpu.memory_space<vmem>>, vector<64x4xf32>
    %cst_7 = arith.constant dense<0.000000e+00> : vector<8x4xf32>
    %8 = tpu.matmul %6, %7, %cst_7 {dimension_numbers = #tpu.dot_dimension_numbers<[1], [0], [0], [1], [0, 0, 1, 1], [], []>} : vector<8x64xf32>, vector<64x4xf32>, vector<8x4xf32> -> vector<8x4xf32>
    %c0_8 = arith.constant 0 : index
    %c0_9 = arith.constant 0 : index
    %9 = vector.load %arg5[%c0_8, %c0_9] : memref<1x4xf32, #tpu.memory_space<vmem>>, vector<1x4xf32>
    %10 = vector.broadcast %9 : vector<1x4xf32> to vector<8x4xf32>
    %11 = arith.addf %8, %10 : vector<8x4xf32>
    %cst_10 = arith.constant dense<0xFF800000> : vector<8xf32>
    %12 = vector.multi_reduction <maximumf>, %11, %cst_10 [1] : vector<8x4xf32> to vector<8xf32>
    %13 = vector.shape_cast %12 : vector<8xf32> to vector<8x1xf32>
    %14 = vector.broadcast %13 : vector<8x1xf32> to vector<8x4xf32>
    %15 = arith.subf %11, %14 : vector<8x4xf32>
    %16 = math.exp %15 : vector<8x4xf32>
    %cst_11 = arith.constant dense<0.000000e+00> : vector<8xf32>
    %17 = vector.multi_reduction <add>, %16, %cst_11 [1] : vector<8x4xf32> to vector<8xf32>
    %18 = vector.shape_cast %17 : vector<8xf32> to vector<8x1xf32>
    %19 = vector.broadcast %18 : vector<8x1xf32> to vector<8x4xf32>
    %20 = arith.divf %16, %19 : vector<8x4xf32>
    %c0_12 = arith.constant 0 : index
    %c0_13 = arith.constant 0 : index
    %21 = vector.load %arg6[%c0_12, %c0_13] : memref<8x4xf32, #tpu.memory_space<vmem>>, vector<8x4xf32>
    tpu.vector_store %arg6[%c0_12, %c0_13], %20 {strides = array<i32>} : memref<8x4xf32, #tpu.memory_space<vmem>>, vector<8x4xf32>,
    return
  }
  func.func @transform_0(%arg0: i32) -> (i32, i32) {
    %c0_i32 = arith.constant 0 : i32
    %c0_i32_0 = arith.constant 0 : i32
    return %arg0, %c0_i32 : i32, i32
  }
  func.func @transform_1(%arg0: i32) -> (i32, i32) {
    %c0_i32 = arith.constant 0 : i32
    %c0_i32_0 = arith.constant 0 : i32
    %c0_i32_1 = arith.constant 0 : i32
    return %c0_i32, %c0_i32_0 : i32, i32
  }
  func.func @transform_2(%arg0: i32) -> (i32, i32) {
    %c0_i32 = arith.constant 0 : i32
    %c0_i32_0 = arith.constant 0 : i32
    %c0_i32_1 = arith.constant 0 : i32
    return %c0_i32, %c0_i32_0 : i32, i32
  }
  func.func @transform_3(%arg0: i32) -> (i32, i32) {
    %c0_i32 = arith.constant 0 : i32
    %c0_i32_0 = arith.constant 0 : i32
    %c0_i32_1 = arith.constant 0 : i32
    return %c0_i32, %c0_i32_0 : i32, i32
  }
  func.func @transform_4(%arg0: i32) -> (i32, i32) {
    %c0_i32 = arith.constant 0 : i32
    %c0_i32_0 = arith.constant 0 : i32
    %c0_i32_1 = arith.constant 0 : i32
    return %c0_i32, %c0_i32_0 : i32, i32
  }
  func.func @transform_5(%arg0: i32) -> (i32, i32) {
    %c0_i32 = arith.constant 0 : i32
    %c0_i32_0 = arith.constant 0 : i32
    return %arg0, %c0_i32 : i32, i32
  }
}

</mosaic_0001>

<bundles_post_ra>
// kernel: model_forward.1
= control target key start
LH: loop header
LB: loop body
LE: loop exit
PB: predicated region body
PF: predicated region fallthrough
CT: control target
= control target key end

     0   :  { %v261_v0 = vmov 0.0   ;;  %vm262_vm0 = vmmov 0   ;;  %vm30_vm1 = vcmask 130048   ;;  %vm120_vm2 = vcmask 523264   ;;  %s338_s1 = inlined_call_operand.vmem [shape: f32[16,64], index: 1, kind: input, shape index: {}]   ;;  %s339_s0 = inlined_call_operand.vmem [shape: f32[8,16], index: 0, kind: input, shape index: {}]   ;;  %s340_s3 = inlined_call_operand.vmem [shape: f32[64,4], index: 3, kind: input, shape index: {}]   ;;  %s341_s2 = inlined_call_operand.vmem [shape: f32[1,64], index: 2, kind: input, shape index: {}]   ;;  %s342_s4 = inlined_call_operand.vmem [shape: f32[1,4], index: 4, kind: input, shape index: {}]   ;;  %s343_s5 = inlined_call_operand.vmem [shape: f32[8,4], index: 5, kind: output, shape index: {}]  }
   0x1   :  { %227 = vmatprep.subr.mxu0 %v261_v0  ;;  %v22_v1 = vld [vmem:[%s338_s1 + $0x8] sm:$0xff]  ;;  %v21_v2 = vld [vmem:[%s338_s1] sm:$0xff]  ;;  %231 = vmatprep.mubr.msk.f32.mxu0 %vm262_vm0, %v261_v0  ;;  %v112_v4 = vld [vmem:[%s340_s3 + $0x38] sm:$0xff]  ;;  %vm194_vm3 = vcmask 31744  }
   0x2   :  { %228 = vmatpush3.msra.mxu0 %v22_v1  ;;  %v20_v3 = vld [vmem:[%s339_s0] sm:$0xff]  ;;  %234 = vmatprep.subr.mxu1 %v261_v0  ;;  %v111_v5 = vld [vmem:[%s340_s3 + $0x30] sm:$0xff]  ;;  %v110_v6 = vld [vmem:[%s340_s3 + $0x28] sm:$0xff] }
   0x3   :  { %229 = vmatprep.subr.mxu0 %v261_v0  ;;  %250 = vmatprep.mubr.msk.f32.mxu1 %vm262_vm0, %v261_v0  ;;  %v109_v7 = vld [vmem:[%s340_s3 + $0x20] sm:$0xff]  ;;  %v108_v8 = vld [vmem:[%s340_s3 + $0x18] sm:$0xff]  ;;  %v107_v9 = vld [vmem:[%s340_s3 + $0x10] sm:$0xff] }
   0x4   :  { %230 = vmatpush3.msra.mxu0 %v21_v2  ;;  %235 = vmatpush3.msra.mxu1 %v112_v4  ;;  %v106_v10 = vld [vmem:[%s340_s3 + $0x8] sm:$0xff]  ;;  %v105_v11 = vld [vmem:[%s340_s3] sm:$0xff] }
   0x5   :  { %232 = vmatmul.mubr.msk.f32.vlgmr.msra.gmra.mxu0 %vm30_vm1, %v20_v3  ;;  %236 = vmatprep.subr.mxu1 %v261_v0  ;;  %v211_v12 = vld [vmem:[%s341_s2] ss:$0 sm:$0xff] }
   0x6   :  { %237 = vmatpush3.msra.mxu1 %v111_v5  ;;  %v213_v17 = vld [vmem:[%s342_s4] ss:$0 sm:$0xff] }
   0x7   :  { %238 = vmatprep.subr.mxu1 %v261_v0 }
   0x8   :  { %239 = vmatpush3.msra.mxu1 %v110_v6 }
   0x9   :  { %240 = vmatprep.subr.mxu1 %v261_v0 }
   0xa   :  { %241 = vmatpush3.msra.mxu1 %v109_v7 }
   0xb   :  { %242 = vmatprep.subr.mxu1 %v261_v0 }
   0xc   :  { %243 = vmatpush3.msra.mxu1 %v108_v8 }
   0xd   :  { %244 = vmatprep.subr.mxu1 %v261_v0 }
   0xe   :  { %245 = vmatpush3.msra.mxu1 %v107_v9 }
   0xf   :  { %246 = vmatprep.subr.mxu1 %v261_v0 }
  0x10   :  { %247 = vmatpush3.msra.mxu1 %v106_v10 }
  0x11   :  { %248 = vmatprep.subr.mxu1 %v261_v0 }
  0x12   :  { %249 = vmatpush3.msra.mxu1 %v105_v11 }
  0xc5   :  { %v100_v13 = vpop.f32.mrf.mxu0 }
  0xc6   :  { %v101_v14 = vadd.f32 %v211_v12, %v100_v13 }
  0xc7   :  { %v233_v15 = vpop.f32.mrf.mxu0 }
  0xc8   :  { %255 = vtanh.f32 %v101_v14 }
  0xd5   :  { %v256_v16 = vpop.eup %255 }
  0xd6   :  { %251 = vmatmul.mubr.msk.f32.vlgmr.msra.gmra.mxu1 %vm120_vm2, %v256_v16 }
 0x196   :  { %v190_v18 = vpop.f32.mrf.mxu1 }
 0x197   :  { %v191_v19 = vadd.f32 %v213_v17, %v190_v18 }
 0x198   :  { %v252_v20 = vpop.f32.mrf.mxu1 }
 0x199   :  { %v195_v21 = vsel %vm194_vm3, %v191_v19, -inf }
 0x19a   :  { %196 = vmax.xlane.f32.xlu0 %v195_v21 }
 0x223   :  { %v197_v22 = vpop.xlane.xlu0 %196 }
 0x224   :  { %v198_v23 = vsub.f32 %v191_v19, %v197_v22 }
 0x226   :  { %v199_v24 = vmul.f32 1.442695, %v198_v23 }
 0x228   :  { %257 = vpow2.f32 %v199_v24 }
 0x235   :  { %v258_v25 = vpop.eup %257 }
 0x236   :  { %v201_v26 = vsel %vm194_vm3, %v258_v25, 0.0 }
 0x237   :  { %202 = vadd.xlane.f32.xlu0 %v201_v26 }
 0x2c0   :  { %v203_v27 = vpop.xlane.xlu0 %202 }
 0x2c1   :  { %259 = vrcp.f32 %v203_v27 }
 0x2ce   :  { %v260_v28 = vpop.eup %259 }
 0x2cf   :  { %v205_v29 = vmul.f32 %v260_v28, %v258_v25 }
 0x2d1   :  { %206 = vst.msk [vmem:[%s343_s5] sm:$0xff] %vm194_vm3, %v205_v29 }

</bundles_post_ra>
